<compile_context>
chip_gen: v7x
topology: tpu7x:2x2x1
jax: 0.10.0
libtpu: 0.0.40
codegen_flags: <defaults>
</compile_context>

<pallas_src>
import jax
import jax.numpy as jnp
from jax.experimental import pallas as pl
from jax.experimental.pallas import tpu as pltpu


def _round_up(x, m):
    return ((x + m - 1) // m) * m


def gaussian_actor_kernel(x_ref, w1_ref, b1_ref, w2_ref, b2_ref,
                          wm_ref, bm_ref, mean_ref):
    # x tile: (tm, in_dim). Weights are (in, out) so the MXU does plain x @ W.
    dot_dt = w1_ref.dtype
    x = x_ref[...].astype(dot_dt)

    # fc1 + ReLU  (f32 accumulation, bias/ReLU in f32)
    h1 = jnp.dot(x, w1_ref[...], preferred_element_type=jnp.float32) + b1_ref[...]
    h1 = jnp.maximum(h1, 0.0)

    # fc2 + ReLU (dropout = identity in eval mode)
    h2 = jnp.dot(h1.astype(dot_dt), w2_ref[...],
                 preferred_element_type=jnp.float32) + b2_ref[...]
    h2 = jnp.maximum(h2, 0.0)

    # mean head — output block is (tm, action_dim), stored un-padded.
    mean = jnp.dot(h2.astype(dot_dt), wm_ref[...],
                   preferred_element_type=jnp.float32) + bm_ref[...]
    mean_ref[...] = mean.astype(mean_ref.dtype)


def prepare_params(params, dot_dtype=jnp.bfloat16):
    """One-time prep: cast weights to the MXU operand dtype and precompute std."""
    w1, b1, w2, b2, wm, bm, log_std = params
    cast = (lambda w: w.astype(dot_dtype)) if dot_dtype != jnp.float32 else (lambda w: w)
    std = jax.nn.softplus(log_std.reshape(-1)) + 0.001   # input-independent
    return (cast(w1), b1, cast(w2), b2, cast(wm), bm, std)


def _choose_tm(B, block_b):
    # Multiple of 8 sublanes; aim for >= 2 grid steps (v7x has 2 TCs) when B > 8,
    # capped at block_b (1024 default keeps v5e/v6e near the HBM roofline).
    half = _round_up(max(1, -(-B // 2)), 8)
    return max(8, min(block_b, half))


def gaussian_actor_forward(x, prepared, block_b=1024, out_dtype=jnp.float32):
    """x: (B, in_dim) float32, prepared = prepare_params(...).
    Returns (mean (B, action_dim), std (action_dim,))."""
    w1, b1, w2, b2, wm, bm, std = prepared
    B, in_dim = x.shape
    hidden = w1.shape[1]
    action_dim = wm.shape[1]

    tm = _choose_tm(B, block_b)
    grid = (pl.cdiv(B, tm),)          # ragged last block handled by the pipeline

    flops = 2 * B * (in_dim * hidden + hidden * hidden + hidden * action_dim)
    bytes_accessed = (
        x.size * x.dtype.itemsize
        + sum(a.size * a.dtype.itemsize for a in (w1, b1, w2, b2, wm, bm))
        + B * action_dim * jnp.dtype(out_dtype).itemsize)

    mean = pl.pallas_call(
        gaussian_actor_kernel,
        out_shape=jax.ShapeDtypeStruct((B, action_dim), out_dtype),
        grid_spec=pltpu.PrefetchScalarGridSpec(
            num_scalar_prefetch=0,
            grid=grid,
            in_specs=[
                # activation tile, streamed / double-buffered along the batch grid
                pl.BlockSpec((tm, in_dim), lambda i: (i, 0)),
                # weights & biases: constant block index -> fetched once, VMEM-resident
                pl.BlockSpec((in_dim, hidden), lambda i: (0, 0)),
                pl.BlockSpec((1, hidden), lambda i: (0, 0)),
                pl.BlockSpec((hidden, hidden), lambda i: (0, 0)),
                pl.BlockSpec((1, hidden), lambda i: (0, 0)),
                pl.BlockSpec((hidden, action_dim), lambda i: (0, 0)),
                pl.BlockSpec((1, action_dim), lambda i: (0, 0)),
            ],
            out_specs=pl.BlockSpec((tm, action_dim), lambda i: (i, 0)),
        ),
        compiler_params=pltpu.CompilerParams(
            dimension_semantics=("parallel",),      # shard batch tiles across TCs (v7x)
            vmem_limit_bytes=64 * 1024 * 1024,      # headroom if hidden is scaled up
        ),
        cost_estimate=pl.CostEstimate(
            flops=flops, transcendentals=0, bytes_accessed=bytes_accessed),
    )(x, w1, b1, w2, b2, wm, bm)

    return mean, std


def init_params(key, in_dim, hidden_dim, action_dim):
    """Deterministic init mimicking nn.Linear default (U[-1/sqrt(fan_in), 1/sqrt(fan_in)])."""
    ks = jax.random.split(key, 6)

    def linear(kw, kb, fan_in, fan_out):
        bound = 1.0 / jnp.sqrt(jnp.float32(fan_in))
        w = jax.random.uniform(kw, (fan_in, fan_out), jnp.float32, -bound, bound)
        b = jax.random.uniform(kb, (1, fan_out), jnp.float32, -bound, bound)
        return w, b

    w1, b1 = linear(ks[0], ks[1], in_dim, hidden_dim)
    w2, b2 = linear(ks[2], ks[3], hidden_dim, hidden_dim)
    wm, bm = linear(ks[4], ks[5], hidden_dim, action_dim)
    log_std = jnp.zeros((action_dim,), jnp.float32)   # nn.Parameter(torch.zeros(action_dim))
    return (w1, b1, w2, b2, wm, bm, log_std)


def _reference(x, params):
    w1, b1, w2, b2, wm, bm, log_std = params
    h = jnp.maximum(x @ w1 + b1, 0.0)
    h = jnp.maximum(h @ w2 + b2, 0.0)
    mean = h @ wm + bm
    std = jax.nn.softplus(log_std.reshape(-1)) + 0.001
    return mean, std


if __name__ == "__main__":
    key = jax.random.PRNGKey(0)
    B, in_dim, hidden_dim, action_dim = 8, 32, 32, 8

    k_x, k_x2, k_p = jax.random.split(key, 3)
    x = jax.random.normal(k_x, (B, in_dim), jnp.float32)
    params = init_params(k_p, in_dim, hidden_dim, action_dim)

    fwd = jax.jit(gaussian_actor_forward, static_argnames=("block_b", "out_dtype"))
    mean_ref_v, std_ref_v = _reference(x, params)

    # --- f32 operand path (tight correctness check) ---------------------------
    prep_f32 = prepare_params(params, dot_dtype=jnp.float32)
    mean, std = fwd(x, prep_f32)
    jax.block_until_ready((mean, std))
    assert mean.shape == (B, action_dim) and std.shape == (action_dim,)
    assert jnp.allclose(mean, mean_ref_v, atol=1e-5)
    assert jnp.allclose(std, std_ref_v, atol=1e-6)

    # --- default bf16-operand path, multi-step ragged grid (B % tm != 0) ------
    B2 = 300
    x2 = jax.random.normal(k_x2, (B2, in_dim), jnp.float32)
    prep_bf16 = prepare_params(params)                 # bf16 MXU operands (default)
    mean2, std2 = fwd(x2, prep_bf16, block_b=128)      # grid = cdiv(300, 128) = 3
    jax.block_until_ready((mean2, std2))
    mean2_ref, _ = _reference(x2, params)
    assert mean2.shape == (B2, action_dim)
    assert jnp.allclose(mean2, mean2_ref, atol=1e-1, rtol=1e-2)
    assert jnp.allclose(std2, std_ref_v, atol=1e-6)

    print("KERNEL_OK")
</pallas_src>

<mosaic_0001>
module attributes {stable_mosaic.version = 11 : i64} {
  func.func @gaussian_actor_kernel(%arg0: i32, %arg1: memref<8x32xf32, #tpu.memory_space<vmem>>, %arg2: memref<32x32xf32, #tpu.memory_space<vmem>>, %arg3: memref<1x32xf32, #tpu.memory_space<vmem>>, %arg4: memref<32x32xf32, #tpu.memory_space<vmem>>, %arg5: memref<1x32xf32, #tpu.memory_space<vmem>>, %arg6: memref<32x8xf32, #tpu.memory_space<vmem>>, %arg7: memref<1x8xf32, #tpu.memory_space<vmem>>, %arg8: memref<8x8xf32, #tpu.memory_space<vmem>>) attributes {dimension_semantics = [#tpu.dimension_semantics<parallel>], iteration_bounds = array<i64: 1>, scalar_prefetch = 0 : i64, scratch_operands = 0 : i64, tpu.core_type = #tpu.core_type<tc>, window_params = [{transform_indices = @transform_0, window_bounds = array<i64: 8, 32>}, {pipeline_mode = #tpu.pipeline_mode<synchronous>, transform_indices = @transform_1, window_bounds = array<i64: 32, 32>}, {pipeline_mode = #tpu.pipeline_mode<synchronous>, transform_indices = @transform_2, window_bounds = array<i64: 1, 32>}, {pipeline_mode = #tpu.pipeline_mode<synchronous>, transform_indices = @transform_3, window_bounds = array<i64: 32, 32>}, {pipeline_mode = #tpu.pipeline_mode<synchronous>, transform_indices = @transform_4, window_bounds = array<i64: 1, 32>}, {pipeline_mode = #tpu.pipeline_mode<synchronous>, transform_indices = @transform_5, window_bounds = array<i64: 32, 8>}, {pipeline_mode = #tpu.pipeline_mode<synchronous>, transform_indices = @transform_6, window_bounds = array<i64: 1, 8>}, {transform_indices = @transform_7, window_bounds = array<i64: 8, 8>}]} {
    %c0 = arith.constant 0 : index
    %c0_0 = arith.constant 0 : index
    %0 = vector.load %arg1[%c0, %c0_0] : memref<8x32xf32, #tpu.memory_space<vmem>>, vector<8x32xf32>
    %c0_1 = arith.constant 0 : index
    %c0_2 = arith.constant 0 : index
    %1 = vector.load %arg2[%c0_1, %c0_2] : memref<32x32xf32, #tpu.memory_space<vmem>>, vector<32x32xf32>
    %cst = arith.constant dense<0.000000e+00> : vector<8x32xf32>
    %2 = tpu.matmul %0, %1, %cst {dimension_numbers = #tpu.dot_dimension_numbers<[1], [0], [0], [1], [0, 0, 1, 1], [], []>} : vector<8x32xf32>, vector<32x32xf32>, vector<8x32xf32> -> vector<8x32xf32>
    %c0_3 = arith.constant 0 : index
    %c0_4 = arith.constant 0 : index
    %3 = vector.load %arg3[%c0_3, %c0_4] : memref<1x32xf32, #tpu.memory_space<vmem>>, vector<1x32xf32>
    %4 = vector.broadcast %3 : vector<1x32xf32> to vector<8x32xf32>
    %5 = arith.addf %2, %4 : vector<8x32xf32>
    %cst_5 = arith.constant 0.000000e+00 : f32
    %6 = vector.broadcast %cst_5 : f32 to vector<8x32xf32>
    %7 = arith.maximumf %5, %6 : vector<8x32xf32>
    %c0_6 = arith.constant 0 : index
    %c0_7 = arith.constant 0 : index
    %8 = vector.load %arg4[%c0_6, %c0_7] : memref<32x32xf32, #tpu.memory_space<vmem>>, vector<32x32xf32>
    %cst_8 = arith.constant dense<0.000000e+00> : vector<8x32xf32>
    %9 = tpu.matmul %7, %8, %cst_8 {dimension_numbers = #tpu.dot_dimension_numbers<[1], [0], [0], [1], [0, 0, 1, 1], [], []>} : vector<8x32xf32>, vector<32x32xf32>, vector<8x32xf32> -> vector<8x32xf32>
    %c0_9 = arith.constant 0 : index
    %c0_10 = arith.constant 0 : index
    %10 = vector.load %arg5[%c0_9, %c0_10] : memref<1x32xf32, #tpu.memory_space<vmem>>, vector<1x32xf32>
    %11 = vector.broadcast %10 : vector<1x32xf32> to vector<8x32xf32>
    %12 = arith.addf %9, %11 : vector<8x32xf32>
    %cst_11 = arith.constant 0.000000e+00 : f32
    %13 = vector.broadcast %cst_11 : f32 to vector<8x32xf32>
    %14 = arith.maximumf %12, %13 : vector<8x32xf32>
    %c0_12 = arith.constant 0 : index
    %c0_13 = arith.constant 0 : index
    %15 = vector.load %arg6[%c0_12, %c0_13] : memref<32x8xf32, #tpu.memory_space<vmem>>, vector<32x8xf32>
    %cst_14 = arith.constant dense<0.000000e+00> : vector<8x8xf32>
    %16 = tpu.matmul %14, %15, %cst_14 {dimension_numbers = #tpu.dot_dimension_numbers<[1], [0], [0], [1], [0, 0, 1, 1], [], []>} : vector<8x32xf32>, vector<32x8xf32>, vector<8x8xf32> -> vector<8x8xf32>
    %c0_15 = arith.constant 0 : index
    %c0_16 = arith.constant 0 : index
    %17 = vector.load %arg7[%c0_15, %c0_16] : memref<1x8xf32, #tpu.memory_space<vmem>>, vector<1x8xf32>
    %18 = vector.broadcast %17 : vector<1x8xf32> to vector<8x8xf32>
    %19 = arith.addf %16, %18 : vector<8x8xf32>
    %c0_17 = arith.constant 0 : index
    %c0_18 = arith.constant 0 : index
    %20 = vector.load %arg8[%c0_17, %c0_18] : memref<8x8xf32, #tpu.memory_space<vmem>>, vector<8x8xf32>
    tpu.vector_store %arg8[%c0_17, %c0_18], %19 {strides = array<i32>} : memref<8x8xf32, #tpu.memory_space<vmem>>, vector<8x8xf32>,
    return
  }
  func.func @transform_0(%arg0: i32) -> (i32, i32) {
    %c0_i32 = arith.constant 0 : i32
    %c0_i32_0 = arith.constant 0 : i32
    return %arg0, %c0_i32 : i32, i32
  }
  func.func @transform_1(%arg0: i32) -> (i32, i32) {
    %c0_i32 = arith.constant 0 : i32
    %c0_i32_0 = arith.constant 0 : i32
    %c0_i32_1 = arith.constant 0 : i32
    return %c0_i32, %c0_i32_0 : i32, i32
  }
  func.func @transform_2(%arg0: i32) -> (i32, i32) {
    %c0_i32 = arith.constant 0 : i32
    %c0_i32_0 = arith.constant 0 : i32
    %c0_i32_1 = arith.constant 0 : i32
    return %c0_i32, %c0_i32_0 : i32, i32
  }
  func.func @transform_3(%arg0: i32) -> (i32, i32) {
    %c0_i32 = arith.constant 0 : i32
    %c0_i32_0 = arith.constant 0 : i32
    %c0_i32_1 = arith.constant 0 : i32
    return %c0_i32, %c0_i32_0 : i32, i32
  }
  func.func @transform_4(%arg0: i32) -> (i32, i32) {
    %c0_i32 = arith.constant 0 : i32
    %c0_i32_0 = arith.constant 0 : i32
    %c0_i32_1 = arith.constant 0 : i32
    return %c0_i32, %c0_i32_0 : i32, i32
  }
  func.func @transform_5(%arg0: i32) -> (i32, i32) {
    %c0_i32 = arith.constant 0 : i32
    %c0_i32_0 = arith.constant 0 : i32
    %c0_i32_1 = arith.constant 0 : i32
    return %c0_i32, %c0_i32_0 : i32, i32
  }
  func.func @transform_6(%arg0: i32) -> (i32, i32) {
    %c0_i32 = arith.constant 0 : i32
    %c0_i32_0 = arith.constant 0 : i32
    %c0_i32_1 = arith.constant 0 : i32
    return %c0_i32, %c0_i32_0 : i32, i32
  }
  func.func @transform_7(%arg0: i32) -> (i32, i32) {
    %c0_i32 = arith.constant 0 : i32
    %c0_i32_0 = arith.constant 0 : i32
    return %arg0, %c0_i32 : i32, i32
  }
}

</mosaic_0001>

<bundles_post_ra>
// kernel: gaussian_actor_forward.1
= control target key start
LH: loop header
LB: loop body
LE: loop exit
PB: predicated region body
PF: predicated region fallthrough
CT: control target
= control target key end

     0   :  { %12 = vsyncpa [#allocation3], 0  ;;  %s825_s0 = inlined_call_operand.hbm [shape: f32[8,32], index: 0, kind: input, shape index: {}]   ;;  %s826_s1 = inlined_call_operand.hbm [shape: f32[32,32], index: 1, kind: input, shape index: {}]   ;;  %s827_s2 = inlined_call_operand.hbm [shape: f32[1,32], index: 2, kind: input, shape index: {}]   ;;  %s828_s3 = inlined_call_operand.hbm [shape: f32[32,32], index: 3, kind: input, shape index: {}]   ;;  %s829_s4 = inlined_call_operand.hbm [shape: f32[1,32], index: 4, kind: input, shape index: {}]   ;;  %s830_s5 = inlined_call_operand.hbm [shape: f32[32,8], index: 5, kind: input, shape index: {}]   ;;  %s831_s6 = inlined_call_operand.hbm [shape: f32[1,8], index: 6, kind: input, shape index: {}]   ;;  %s832_s7 = inlined_call_operand.hbm [shape: f32[8,8], index: 7, kind: output, shape index: {}]  }
   0x1   :  { %13 = vsyncpa [#allocation6], 0 }
   0x2   :  { %14 = vsyncpa [#allocation9], 0 }
   0x3   :  { %15 = vsyncpa [#allocation12], 0 }
   0x4   :  { %16 = vsyncpa [#allocation4], 0  ;;  %s661_s24 = smov [#allocation5]   ;;  %s475_s28 = scalar_lea.hbm %s826_s1, 512 }
   0x5   :  { %s32_s25 = sshll.u32 %s661_s24, 4  ;;  %p476_p0 = scmp.ne.s32.totalorder %s826_s1, %s475_s28  ;;  %s33_s25 = int_to_ptr.vmem [resolvable:$true] %s32_s25 }
   0x6   :  { %p479_p1 = scmp.lt.u32.totalorder %s475_s28, %s826_s1 }
   0x8   :  { %p481_p2 = pnand %p479_p1, %p476_p0 }
   0xa   :  { %484 = shalt.err (!%p481_p2)
}
   0xb   :  { %s485_s10 = scalar_lea.vmem %s33_s25, 512  ;;  %p490_p4 = scmp.lt.s32.totalorder %s33_s25, %s33_s25 }
   0xc   :  { %p486_p3 = scmp.ne.s32.totalorder %s33_s25, %s485_s10  ;;  %p491_p5 = scmp.lt.s32.totalorder %s485_s10, %s485_s10 }
   0xe   :  { %p492_p6 = por %p491_p5, %p490_p4 }
  0x10   :  { %p493_p7 = pnand %p492_p6, %p486_p3 }
  0x12   :  { %496 = shalt.err (!%p493_p7)
}
  0x13   :  { %s662_s11 = smov 128   ;;  %s663_s12 = smov 8  }
  0x14   :  { %38 = dma.hbm_to_vmem [thread:$0]  %s826_s1, 512, %s33_s25, [#allocation6], %s662_s11, %s662_s11, %s663_s12  }
  0x15   :  { %s664_s15 = smov [#allocation8]   ;;  %s665_s17 = smov [#allocation11]  }
  0x16   :  { %s54_s16 = sshll.u32 %s664_s15, 4  ;;  %s76_s18 = sshll.u32 %s665_s17, 4  ;;  %s55_s16 = int_to_ptr.vmem [resolvable:$true] %s54_s16  ;;  %s77_s18 = int_to_ptr.vmem [resolvable:$true] %s76_s18 }
  0x17   :  { %s497_s21 = scalar_lea.hbm %s828_s3, 512 }
  0x18   :  { %p498_p8 = scmp.ne.s32.totalorder %s828_s3, %s497_s21  ;;  %p501_p9 = scmp.lt.u32.totalorder %s497_s21, %s828_s3 }
  0x1a   :  { %p503_p10 = pnand %p501_p9, %p498_p8 }
  0x1c   :  { %506 = shalt.err (!%p503_p10)
}
  0x1d   :  { %s507_s1 = scalar_lea.vmem %s55_s16, 512  ;;  %p512_p12 = scmp.lt.s32.totalorder %s55_s16, %s55_s16 }
  0x1e   :  { %p508_p11 = scmp.ne.s32.totalorder %s55_s16, %s507_s1  ;;  %p513_p13 = scmp.lt.s32.totalorder %s507_s1, %s507_s1 }
  0x20   :  { %p514_p0 = por %p513_p13, %p512_p12 }
  0x22   :  { %p515_p1 = pnand %p514_p0, %p508_p11 }
  0x24   :  { %518 = shalt.err (!%p515_p1)
}
  0x25   :  { %60 = dma.hbm_to_vmem [thread:$0]  %s828_s3, 512, %s55_s16, [#allocation9], %s662_s11, %s662_s11, %s663_s12  }
  0x26   :  { %s519_s30 = scalar_lea.hbm %s830_s5, 512 }
  0x27   :  { %p520_p2 = scmp.ne.s32.totalorder %s830_s5, %s519_s30  ;;  %p523_p3 = scmp.lt.u32.totalorder %s519_s30, %s830_s5 }
  0x29   :  { %p525_p4 = pnand %p523_p3, %p520_p2 }
  0x2b   :  { %528 = shalt.err (!%p525_p4)
}
  0x2c   :  { %s529_s14 = scalar_lea.vmem %s77_s18, 512  ;;  %p534_p6 = scmp.lt.s32.totalorder %s77_s18, %s77_s18 }
  0x2d   :  { %p530_p5 = scmp.ne.s32.totalorder %s77_s18, %s529_s14  ;;  %p535_p7 = scmp.lt.s32.totalorder %s529_s14, %s529_s14 }
  0x2f   :  { %p536_p8 = por %p535_p7, %p534_p6 }
  0x31   :  { %p537_p9 = pnand %p536_p8, %p530_p5 }
  0x33   :  { %540 = shalt.err (!%p537_p9)
}
  0x34   :  { %82 = dma.hbm_to_vmem [thread:$0]  %s830_s5, 512, %s77_s18, [#allocation12], %s662_s11, %s662_s11, %s663_s12  }
  0x35   :  { %s666_s16 = smov [#allocation2]   ;;  %s667_s19 = smov [#allocation7]  }
  0x36   :  { %s23_s17 = sshll.u32 %s666_s16, 4  ;;  %s45_s20 = sshll.u32 %s667_s19, 4  ;;  %s24_s17 = int_to_ptr.vmem [resolvable:$true] %s23_s17  ;;  %s46_s20 = int_to_ptr.vmem [resolvable:$true] %s45_s20 }
  0x37   :  { %s541_s23 = scalar_lea.hbm %s825_s0, 128 }
  0x38   :  { %p542_p10 = scmp.ne.s32.totalorder %s825_s0, %s541_s23  ;;  %p545_p11 = scmp.lt.u32.totalorder %s541_s23, %s825_s0 }
  0x3a   :  { %p547_p12 = pnand %p545_p11, %p542_p10 }
  0x3c   :  { %550 = shalt.err (!%p547_p12)
}
  0x3d   :  { %s551_s5 = scalar_lea.vmem %s24_s17, 128  ;;  %p556_p0 = scmp.lt.s32.totalorder %s24_s17, %s24_s17 }
  0x3e   :  { %p552_p13 = scmp.ne.s32.totalorder %s24_s17, %s551_s5  ;;  %p557_p1 = scmp.lt.s32.totalorder %s551_s5, %s551_s5 }
  0x40   :  { %p558_p2 = por %p557_p1, %p556_p0 }
  0x42   :  { %p559_p3 = pnand %p558_p2, %p552_p13 }
  0x44   :  { %562 = shalt.err (!%p559_p3)
}
  0x45   :  { %26 = dma.hbm_to_vmem [thread:$0]  %s825_s0, 128, %s24_s17, [#allocation3]  }
  0x46   :  { %s563_s28 = scalar_lea.hbm %s827_s2, 16 }
  0x47   :  { %p564_p4 = scmp.ne.s32.totalorder %s827_s2, %s563_s28  ;;  %p567_p5 = scmp.lt.u32.totalorder %s563_s28, %s827_s2 }
  0x49   :  { %p569_p6 = pnand %p567_p5, %p564_p4 }
  0x4b   :  { %572 = shalt.err (!%p569_p6)
}
  0x4c   :  { %s573_s10 = scalar_lea.vmem %s46_s20, 16  ;;  %s577_s13 = scalar_lea.vmem %s46_s20, 32 }
  0x4d   :  { %p574_p7 = scmp.ne.s32.totalorder %s46_s20, %s573_s10  ;;  %p578_p8 = scmp.lt.s32.totalorder %s46_s20, %s46_s20 }
  0x4e   :  { %p579_p9 = scmp.lt.s32.totalorder %s577_s13, %s573_s10 }
  0x50   :  { %p580_p10 = por %p579_p9, %p578_p8 }
  0x52   :  { %p581_p11 = pnand %p580_p10, %p574_p7 }
  0x54   :  { %584 = shalt.err (!%p581_p11)
}
  0x55   :  { %48 = dma.hbm_to_vmem [thread:$0]  %s827_s2, 16, %s46_s20, [#allocation6]  }
  0x56   :  { %s668_s3 = smov [#allocation10]   ;;  %s669_s16 = smov [#allocation13]  }
  0x57   :  { %s67_s15 = sshll.u32 %s668_s3, 4  ;;  %s89_s17 = sshll.u32 %s669_s16, 4  ;;  %s68_s15 = int_to_ptr.vmem [resolvable:$true] %s67_s15  ;;  %s90_s17 = int_to_ptr.vmem [resolvable:$true] %s89_s17 }
  0x58   :  { %s585_s22 = scalar_lea.hbm %s829_s4, 16 }
  0x59   :  { %p586_p12 = scmp.ne.s32.totalorder %s829_s4, %s585_s22  ;;  %p589_p13 = scmp.lt.u32.totalorder %s585_s22, %s829_s4 }
  0x5b   :  { %p591_p0 = pnand %p589_p13, %p586_p12 }
  0x5d   :  { %594 = shalt.err (!%p591_p0)
}
  0x5e   :  { %s595_s2 = scalar_lea.vmem %s68_s15, 16  ;;  %s599_s20 = scalar_lea.vmem %s68_s15, 32 }
  0x5f   :  { %p596_p1 = scmp.ne.s32.totalorder %s68_s15, %s595_s2  ;;  %p600_p2 = scmp.lt.s32.totalorder %s68_s15, %s68_s15 }
  0x60   :  { %p601_p3 = scmp.lt.s32.totalorder %s599_s20, %s595_s2 }
  0x62   :  { %p602_p4 = por %p601_p3, %p600_p2 }
  0x64   :  { %p603_p5 = pnand %p602_p4, %p596_p1 }
  0x66   :  { %606 = shalt.err (!%p603_p5)
}
  0x67   :  { %70 = dma.hbm_to_vmem [thread:$0]  %s829_s4, 16, %s68_s15, [#allocation9]  }
  0x68   :  { %s607_s18 = scalar_lea.hbm %s831_s6, 16 }
  0x69   :  { %p608_p6 = scmp.ne.s32.totalorder %s831_s6, %s607_s18  ;;  %p611_p7 = scmp.lt.u32.totalorder %s607_s18, %s831_s6 }
  0x6b   :  { %p613_p8 = pnand %p611_p7, %p608_p6 }
  0x6d   :  { %616 = shalt.err (!%p613_p8)
}
  0x6e   :  { %s617_s8 = scalar_lea.vmem %s90_s17, 16  ;;  %s621_s9 = scalar_lea.vmem %s90_s17, 32 }
  0x6f   :  { %p618_p9 = scmp.ne.s32.totalorder %s90_s17, %s617_s8  ;;  %p622_p10 = scmp.lt.s32.totalorder %s90_s17, %s90_s17 }
  0x70   :  { %p623_p11 = scmp.lt.s32.totalorder %s621_s9, %s617_s8 }
  0x72   :  { %p624_p12 = por %p623_p11, %p622_p10 }
  0x74   :  { %p625_p13 = pnand %p624_p12, %p618_p9 }
  0x76   :  { %628 = shalt.err (!%p625_p13)
}
  0x77   :  { %92 = dma.hbm_to_vmem [thread:$0]  %s831_s6, 16, %s90_s17, [#allocation12]  }
  0x78   :  { %651 = dma.done.wait [#allocation3], 128  }
  0x79   :  { %652 = vsyncadd [#allocation3], 4294967168 }
  0x7a   :  { %653 = dma.done.wait [#allocation6], 528  }
  0x7b   :  { %654 = vsyncadd [#allocation6], 4294966768 }
  0x7c   :  { %655 = dma.done.wait [#allocation9], 528  }
  0x7d   :  { %656 = vsyncadd [#allocation9], 4294966768 }
  0x7e   :  { %657 = dma.done.wait [#allocation12], 528  }
  0x7f   :  { %658 = vsyncadd [#allocation12], 4294966768  ;;  %v670_v0 = vmov 0.0|0.0   ;;  %vm671_vm0 = vmmov 0   ;;  %v672_v1 = vmov 0.0   ;;  %v115_v2 = vld [vmem:[#allocation5] sm:$0xff] }
  0x80   :  { %444 = vmatprep.subr.bf16.mxu0 %v670_v0  ;;  %419 = vmatprep.mubr.msk.f32.mxu0 %vm671_vm0, %v672_v1  ;;  %v116_v3 = vld [vmem:[#allocation5 + $0x8] sm:$0xff]  ;;  %v117_v4 = vld [vmem:[#allocation5 + $0x10] sm:$0xff]  ;;  %v118_v6 = vld [vmem:[#allocation5 + $0x18] sm:$0xff]  ;;  %vm126_vm1 = vcmask 261120   ;;  %s673_s6 = smov [#allocation14]   ;;  %vm370_vm2 = vcmask 64512  }
  0x81   :  { %450 = vmatprep.subr.bf16.mxu1 %v670_v0  ;;  %430 = vmatprep.mubr.msk.f32.mxu1 %vm671_vm0, %v672_v1  ;;  %v445_v5 = vpack.c.bf16 %v116_v3, %v115_v2  ;;  %v201_v7 = vld [vmem:[#allocation8] sm:$0xff]  ;;  %v202_v8 = vld [vmem:[#allocation8 + $0x8] sm:$0xff]  ;;  %v448_v9 = vpack.c.bf16 %v118_v6, %v117_v4  ;;  %v114_v11 = vld [vmem:[#allocation2] sm:$0xff]  ;;  %s378_s13 = sshll.u32 %s673_s6, 4  ;;  %s379_s13 = int_to_ptr.vmem [resolvable:$true] %s378_s13 }
  0x82   :  { %v451_v10 = vpack.c.bf16 %v202_v8, %v201_v7  ;;  %v203_v12 = vld [vmem:[#allocation8 + $0x10] sm:$0xff]  ;;  %v204_v13 = vld [vmem:[#allocation8 + $0x18] sm:$0xff]  ;;  %v286_v15 = vld [vmem:[#allocation11] sm:$0xff]  ;;  %s629_s0 = scalar_lea.vmem %s379_s13, 128  ;;  %p634_p1 = scmp.lt.s32.totalorder %s379_s13, %s379_s13 }
  0x83   :  { %446 = vmatpush3.bf16.msra.mxu0 %v445_v5  ;;  %v454_v14 = vpack.c.bf16 %v204_v13, %v203_v12  ;;  %v287_v16 = vld [vmem:[#allocation11 + $0x8] sm:$0xff]  ;;  %v390_v18 = vld [vmem:[#allocation7] ss:$0 sm:$0xff]  ;;  %v288_v23 = vld [vmem:[#allocation11 + $0x10] sm:$0xff]  ;;  %p630_p0 = scmp.ne.s32.totalorder %s379_s13, %s629_s0  ;;  %p635_p2 = scmp.lt.s32.totalorder %s629_s0, %s629_s0 }
  0x84   :  { %447 = vmatprep.subr.bf16.mxu0 %v670_v0  ;;  %452 = vmatpush3.bf16.msra.mxu1 %v451_v10  ;;  %v457_v17 = vpack.c.bf16 %v287_v16, %v286_v15  ;;  %v289_v24 = vld [vmem:[#allocation11 + $0x18] sm:$0xff]  ;;  %v394_v31 = vld [vmem:[#allocation13] ss:$0 sm:$0xff] }
  0x85   :  { %453 = vmatprep.subr.bf16.mxu1 %v670_v0  ;;  %v460_v25 = vpack.c.bf16 %v289_v24, %v288_v23  ;;  %v392_v26 = vld [vmem:[#allocation10] ss:$0 sm:$0xff]  ;;  %p636_p3 = por %p635_p2, %p634_p1 }
  0x87   :  { %449 = vmatpush3.bf16.msra.mxu0 %v448_v9  ;;  %p637_p4 = pnand %p636_p3, %p630_p0 }
  0x88   :  { %456 = vmatprep.subr.bf16.mxu0 %v670_v0  ;;  %455 = vmatpush3.bf16.msra.mxu1 %v454_v14 }
  0x8a   :  { %420 = vmatmul.mubr.msk.f32.vlgmr.msra.gmra.mrb[0].mxu0 %vm126_vm1, %v114_v11 }
  0x8b   :  { %441 = vmatprep.mubr.msk.f32.mxu0 %vm671_vm0, %v672_v1  ;;  %458 = vmatpush3.bf16.msra.mxu0 %v457_v17 }
  0x8c   :  { %459 = vmatprep.subr.bf16.mxu0 %v670_v0 }
  0x8f   :  { %461 = vmatpush3.bf16.msra.mxu0 %v460_v25 }
 0x15d   :  { %v196_v19 = vpop.f32.mrb[0].mxu0 }
 0x15e   :  { %v197_v20 = vadd.f32 %v390_v18, %v196_v19  ;;  %v421_v21 = vpop.f32.mrb[1].mxu0 }
 0x160   :  { %v200_v22 = vmax.f32 %v197_v20, 0.0 }
 0x162   :  { %431 = vmatmul.mubr.msk.f32.vlgmr.msra.gmra.mrb[0].mxu1 %vm126_vm1, %v200_v22 }
 0x235   :  { %v281_v27 = vpop.f32.mrb[0].mxu1 }
 0x236   :  { %v282_v28 = vadd.f32 %v392_v26, %v281_v27  ;;  %v432_v29 = vpop.f32.mrb[1].mxu1 }
 0x238   :  { %v285_v30 = vmax.f32 %v282_v28, 0.0 }
 0x23a   :  { %442 = vmatmul.mubr.msk.f32.vlgmr.msra.gmra.mrb[2].mxu0 %vm126_vm1, %v285_v30 }
 0x30d   :  { %v366_v32 = vpop.f32.mrb[2].mxu0 }
 0x30e   :  { %v367_v33 = vadd.f32 %v394_v31, %v366_v32  ;;  %v443_v34 = vpop.f32.mrb[3].mxu0 }
 0x310   :  { %371 = vst.msk [vmem:[#allocation14] sm:$0xff] %vm370_vm2, %v367_v33 }
 0x311   :  { %640 = shalt.err (!%p637_p4)
}
 0x312   :  { %s641_s15 = scalar_lea.hbm %s832_s7, 128 }
 0x313   :  { %p642_p5 = scmp.ne.s32.totalorder %s832_s7, %s641_s15  ;;  %p645_p6 = scmp.lt.u32.totalorder %s641_s15, %s832_s7 }
 0x315   :  { %p647_p7 = pnand %p645_p6, %p642_p5 }
 0x317   :  { %650 = shalt.err (!%p647_p7)
}
 0x318   :  { %381 = dma.vmem_to_hbm [thread:$0]  %s379_s13, 128, %s832_s7, [#allocation4]  }
 0x319   :  { %659 = dma.done.wait [#allocation4], 128  }
 0x31a   :  { %660 = vsyncadd [#allocation4], 4294967168 }
 0x31b   :  { %385 = vsyncpa [#allocation3], 1 }
 0x31c   :  { %386 = vsyncpa [#allocation6], 1 }
 0x31d   :  { %387 = vsyncpa [#allocation9], 1 }
 0x31e   :  { %388 = vsyncpa [#allocation12], 1 }
 0x31f   :  { %389 = vsyncpa [#allocation4], 1 }

</bundles_post_ra>
